<compile_context>
chip_gen: v7x
topology: tpu7x:2x2x1
jax: 0.10.0
libtpu: 0.0.40
codegen_flags: <defaults>
</compile_context>

<pallas_src>
import functools

import jax
import jax.numpy as jnp
from jax.experimental import pallas as pl
from jax.experimental.pallas import tpu as pltpu


def _round_up(n, m):
    return ((n + m - 1) // m) * m


def _se_kernel(x_ref, w1t_ref, b1_ref, w2t_ref, b2_ref, o_ref, *, inv_hw):
    # x_ref: (Bt, C, HWp) block covering Bt batch elements.
    x = x_ref[...].astype(jnp.float32)                          # (Bt, C, HWp)

    # ---- squeeze: global average pool over spatial dims ----
    # Spatial padding (if any) is zeros, so sum * 1/true_HW == true mean.
    y = jnp.sum(x, axis=2) * inv_hw                             # (Bt, C)

    # ---- excitation: fc1 -> relu -> fc2 -> sigmoid ----
    h = jnp.dot(y, w1t_ref[...], preferred_element_type=jnp.float32) + b1_ref[...]
    h = jnp.maximum(h, 0.0)                                     # (Bt, hid_pad)
    s = jnp.dot(h, w2t_ref[...], preferred_element_type=jnp.float32) + b2_ref[...]
    s = jax.nn.sigmoid(s)                                       # (Bt, C)

    # ---- scale ----
    o_ref[...] = (x * s[:, :, None]).astype(o_ref.dtype)


def _pick_batch_tile(B, per_batch_bytes, target_block_bytes, vmem_limit_bytes):
    """Largest batch tile that (a) hits ~target_block_bytes DMAs, (b) fits a
    conservative VMEM budget, and (c) divides B when that does not shrink the
    block too much (avoids batch padding + the extra slice copy)."""
    bt_target = max(1, target_block_bytes // per_batch_bytes)
    # double-buffered input + output blocks -> 4x one block; keep under half
    # the scoped-VMEM limit to leave headroom for weights / intermediates.
    bt_vmem = max(1, (vmem_limit_bytes // 2) // (4 * per_batch_bytes))
    bt = int(min(B, bt_target, bt_vmem))
    # Prefer a divisor of B (no padding) unless it would halve the block size.
    best_div = 1
    for d in range(bt, 0, -1):
        if B % d == 0:
            best_div = d
            break
    if best_div * 2 >= bt:
        bt = best_div
    return bt


@functools.partial(jax.jit, static_argnames=("target_block_bytes", "vmem_limit_bytes"))
def se_block(x, w1, b1, w2, b2, *,
             target_block_bytes=2 << 20,     # ~2 MiB blocks: near HBM roofline
             vmem_limit_bytes=32 << 20):     # safe on v5e (16 MiB default) .. v7x (64 MiB phys)
    """x: (B, C, H, W); w1: (hidden, C); b1: (hidden,); w2: (C, hidden); b2: (C,).
    Returns (B, C, H, W), same dtype as x."""
    B, C, H, W = x.shape
    hidden = w1.shape[0]
    HW = H * W
    HW_pad = _round_up(HW, 128)          # lane-dense last dim (unmasked stores)
    hid_pad = _round_up(hidden, 128)     # lane-dense excitation intermediate

    elem_bytes = int(jnp.dtype(x.dtype).itemsize)

    # ---- flatten (free bitcast) + zero-pad spatial dim only if needed ----
    x_flat = x.reshape(B, C, HW)
    if HW_pad != HW:
        x_flat = jnp.pad(x_flat, ((0, 0), (0, 0), (0, HW_pad - HW)))

    # ---- pick batch tile Bt ----
    per_batch_bytes = C * HW_pad * elem_bytes
    Bt = _pick_batch_tile(B, per_batch_bytes, target_block_bytes, vmem_limit_bytes)
    num_blocks = (B + Bt - 1) // Bt
    B_pad = num_blocks * Bt
    if B_pad != B:
        x_flat = jnp.pad(x_flat, ((0, B_pad - B), (0, 0), (0, 0)))

    # ---- pre-transpose + zero-pad weights to lane-dense shapes (tiny arrays) ----
    w1t = jnp.zeros((C, hid_pad), jnp.float32).at[:, :hidden].set(w1.T.astype(jnp.float32))
    b1p = jnp.zeros((1, hid_pad), jnp.float32).at[:, :hidden].set(b1.astype(jnp.float32))
    w2t = jnp.zeros((hid_pad, C), jnp.float32).at[:hidden, :].set(w2.T.astype(jnp.float32))
    b2p = b2.reshape(1, C).astype(jnp.float32)

    kernel = functools.partial(_se_kernel, inv_hw=1.0 / float(HW))

    cost = pl.CostEstimate(
        flops=int(2 * B * C * hid_pad + 2 * B * hid_pad * C + B * C * HW),
        transcendentals=int(B * C),
        bytes_accessed=int(2 * B * C * HW * elem_bytes),
    )

    out_flat = pl.pallas_call(
        kernel,
        out_shape=jax.ShapeDtypeStruct((B_pad, C, HW_pad), x.dtype),
        grid_spec=pltpu.PrefetchScalarGridSpec(
            num_scalar_prefetch=0,
            grid=(num_blocks,),
            in_specs=[
                pl.BlockSpec((Bt, C, HW_pad), lambda b: (b, 0, 0)),   # x (Bt batches)
                pl.BlockSpec((C, hid_pad), lambda b: (0, 0)),         # w1^T (padded)
                pl.BlockSpec((1, hid_pad), lambda b: (0, 0)),         # b1  (padded)
                pl.BlockSpec((hid_pad, C), lambda b: (0, 0)),         # w2^T (padded)
                pl.BlockSpec((1, C), lambda b: (0, 0)),               # b2
            ],
            out_specs=pl.BlockSpec((Bt, C, HW_pad), lambda b: (b, 0, 0)),
        ),
        compiler_params=pltpu.CompilerParams(
            dimension_semantics=("parallel",),
            vmem_limit_bytes=vmem_limit_bytes,
        ),
        cost_estimate=cost,
    )(x_flat, w1t, b1p, w2t, b2p)

    # Slice only when padding was actually applied (keeps the aligned case
    # free of an extra HBM read+write pass).
    if B_pad != B or HW_pad != HW:
        out_flat = out_flat[:B, :, :HW]
    return out_flat.reshape(B, C, H, W)


def _init_linear(key, out_features, in_features):
    # Deterministic init mimicking torch.nn.Linear (uniform ±1/sqrt(fan_in)).
    kw, kb = jax.random.split(key)
    bound = 1.0 / jnp.sqrt(jnp.float32(in_features))
    w = jax.random.uniform(kw, (out_features, in_features), jnp.float32,
                           minval=-bound, maxval=bound)
    b = jax.random.uniform(kb, (out_features,), jnp.float32,
                           minval=-bound, maxval=bound)
    return w, b


def _reference(x, w1, b1, w2, b2):
    y = jnp.mean(x, axis=(2, 3))                               # (B, C)
    y = jnp.maximum(y @ w1.T + b1, 0.0)
    y = jax.nn.sigmoid(y @ w2.T + b2)
    return x * y[:, :, None, None]


if __name__ == "__main__":
    B, C, H, W = 2, 32, 16, 16
    reduction = 8
    hidden = C // reduction

    key = jax.random.PRNGKey(0)
    kx, k1, k2 = jax.random.split(key, 3)

    x = jax.random.normal(kx, (B, C, H, W), jnp.float32)
    w1, b1 = _init_linear(k1, hidden, C)
    w2, b2 = _init_linear(k2, C, hidden)

    out = se_block(x, w1, b1, w2, b2)
    out = jax.block_until_ready(out)

    ref = _reference(x, w1, b1, w2, b2)
    assert out.shape == (B, C, H, W)
    assert jnp.allclose(out, ref, atol=1e-5, rtol=1e-5)

    print("KERNEL_OK")
</pallas_src>

<mosaic_0001>
module attributes {stable_mosaic.version = 11 : i64} {
  func.func @_se_kernel(%arg0: i32, %arg1: memref<2x32x256xf32, #tpu.memory_space<vmem>>, %arg2: memref<32x128xf32, #tpu.memory_space<vmem>>, %arg3: memref<1x128xf32, #tpu.memory_space<vmem>>, %arg4: memref<128x32xf32, #tpu.memory_space<vmem>>, %arg5: memref<1x32xf32, #tpu.memory_space<vmem>>, %arg6: memref<2x32x256xf32, #tpu.memory_space<vmem>>) attributes {dimension_semantics = [#tpu.dimension_semantics<parallel>], iteration_bounds = array<i64: 1>, scalar_prefetch = 0 : i64, scratch_operands = 0 : i64, tpu.core_type = #tpu.core_type<tc>, window_params = [{transform_indices = @transform_0, window_bounds = array<i64: 2, 32, 256>}, {pipeline_mode = #tpu.pipeline_mode<synchronous>, transform_indices = @transform_1, window_bounds = array<i64: 32, 128>}, {pipeline_mode = #tpu.pipeline_mode<synchronous>, transform_indices = @transform_2, window_bounds = array<i64: 1, 128>}, {pipeline_mode = #tpu.pipeline_mode<synchronous>, transform_indices = @transform_3, window_bounds = array<i64: 128, 32>}, {pipeline_mode = #tpu.pipeline_mode<synchronous>, transform_indices = @transform_4, window_bounds = array<i64: 1, 32>}, {transform_indices = @transform_5, window_bounds = array<i64: 2, 32, 256>}]} {
    %c0 = arith.constant 0 : index
    %c0_0 = arith.constant 0 : index
    %c0_1 = arith.constant 0 : index
    %0 = vector.load %arg1[%c0, %c0_0, %c0_1] : memref<2x32x256xf32, #tpu.memory_space<vmem>>, vector<2x32x256xf32>
    %cst = arith.constant dense<0.000000e+00> : vector<2x32xf32>
    %1 = vector.multi_reduction <add>, %0, %cst [2] : vector<2x32x256xf32> to vector<2x32xf32>
    %cst_2 = arith.constant 3.906250e-03 : f32
    %2 = vector.broadcast %cst_2 : f32 to vector<2x32xf32>
    %3 = arith.mulf %1, %2 : vector<2x32xf32>
    %c0_3 = arith.constant 0 : index
    %c0_4 = arith.constant 0 : index
    %4 = vector.load %arg2[%c0_3, %c0_4] : memref<32x128xf32, #tpu.memory_space<vmem>>, vector<32x128xf32>
    %cst_5 = arith.constant dense<0.000000e+00> : vector<2x128xf32>
    %5 = tpu.matmul %3, %4, %cst_5 {dimension_numbers = #tpu.dot_dimension_numbers<[1], [0], [0], [1], [0, 0, 1, 1], [], []>} : vector<2x32xf32>, vector<32x128xf32>, vector<2x128xf32> -> vector<2x128xf32>
    %c0_6 = arith.constant 0 : index
    %c0_7 = arith.constant 0 : index
    %6 = vector.load %arg3[%c0_6, %c0_7] : memref<1x128xf32, #tpu.memory_space<vmem>>, vector<1x128xf32>
    %7 = vector.broadcast %6 : vector<1x128xf32> to vector<2x128xf32>
    %8 = arith.addf %5, %7 : vector<2x128xf32>
    %cst_8 = arith.constant 0.000000e+00 : f32
    %9 = vector.broadcast %cst_8 : f32 to vector<2x128xf32>
    %10 = arith.maximumf %8, %9 : vector<2x128xf32>
    %c0_9 = arith.constant 0 : index
    %c0_10 = arith.constant 0 : index
    %11 = vector.load %arg4[%c0_9, %c0_10] : memref<128x32xf32, #tpu.memory_space<vmem>>, vector<128x32xf32>
    %cst_11 = arith.constant dense<0.000000e+00> : vector<2x32xf32>
    %12 = tpu.matmul %10, %11, %cst_11 {dimension_numbers = #tpu.dot_dimension_numbers<[1], [0], [0], [1], [0, 0, 1, 1], [], []>} : vector<2x128xf32>, vector<128x32xf32>, vector<2x32xf32> -> vector<2x32xf32>
    %c0_12 = arith.constant 0 : index
    %c0_13 = arith.constant 0 : index
    %13 = vector.load %arg5[%c0_12, %c0_13] : memref<1x32xf32, #tpu.memory_space<vmem>>, vector<1x32xf32>
    %14 = vector.broadcast %13 : vector<1x32xf32> to vector<2x32xf32>
    %15 = arith.addf %12, %14 : vector<2x32xf32>
    %16 = arith.negf %15 : vector<2x32xf32>
    %17 = math.exp %16 : vector<2x32xf32>
    %cst_14 = arith.constant 1.000000e+00 : f32
    %18 = vector.broadcast %cst_14 : f32 to vector<2x32xf32>
    %19 = arith.addf %18, %17 : vector<2x32xf32>
    %20 = arith.divf %18, %19 : vector<2x32xf32>
    %21 = vector.shape_cast %20 : vector<2x32xf32> to vector<2x32x1xf32>
    %22 = vector.broadcast %21 : vector<2x32x1xf32> to vector<2x32x256xf32>
    %23 = arith.mulf %0, %22 : vector<2x32x256xf32>
    %c0_15 = arith.constant 0 : index
    %c0_16 = arith.constant 0 : index
    %c0_17 = arith.constant 0 : index
    %24 = vector.load %arg6[%c0_15, %c0_16, %c0_17] : memref<2x32x256xf32, #tpu.memory_space<vmem>>, vector<2x32x256xf32>
    tpu.vector_store %arg6[%c0_15, %c0_16, %c0_17], %23 {strides = array<i32>} : memref<2x32x256xf32, #tpu.memory_space<vmem>>, vector<2x32x256xf32>,
    return
  }
  func.func @transform_0(%arg0: i32) -> (i32, i32, i32) {
    %c0_i32 = arith.constant 0 : i32
    %c0_i32_0 = arith.constant 0 : i32
    %c0_i32_1 = arith.constant 0 : i32
    return %arg0, %c0_i32, %c0_i32_0 : i32, i32, i32
  }
  func.func @transform_1(%arg0: i32) -> (i32, i32) {
    %c0_i32 = arith.constant 0 : i32
    %c0_i32_0 = arith.constant 0 : i32
    %c0_i32_1 = arith.constant 0 : i32
    return %c0_i32, %c0_i32_0 : i32, i32
  }
  func.func @transform_2(%arg0: i32) -> (i32, i32) {
    %c0_i32 = arith.constant 0 : i32
    %c0_i32_0 = arith.constant 0 : i32
    %c0_i32_1 = arith.constant 0 : i32
    return %c0_i32, %c0_i32_0 : i32, i32
  }
  func.func @transform_3(%arg0: i32) -> (i32, i32) {
    %c0_i32 = arith.constant 0 : i32
    %c0_i32_0 = arith.constant 0 : i32
    %c0_i32_1 = arith.constant 0 : i32
    return %c0_i32, %c0_i32_0 : i32, i32
  }
  func.func @transform_4(%arg0: i32) -> (i32, i32) {
    %c0_i32 = arith.constant 0 : i32
    %c0_i32_0 = arith.constant 0 : i32
    %c0_i32_1 = arith.constant 0 : i32
    return %c0_i32, %c0_i32_0 : i32, i32
  }
  func.func @transform_5(%arg0: i32) -> (i32, i32, i32) {
    %c0_i32 = arith.constant 0 : i32
    %c0_i32_0 = arith.constant 0 : i32
    %c0_i32_1 = arith.constant 0 : i32
    return %arg0, %c0_i32, %c0_i32_0 : i32, i32, i32
  }
}

</mosaic_0001>

<bundles_post_ra>
// kernel: se_block.1
= control target key start
LH: loop header
LB: loop body
LE: loop exit
PB: predicated region body
PF: predicated region fallthrough
CT: control target
= control target key end

     0   :  { %v491_v27 = vmov 0.0|0.0   ;;  %vm492_vm0 = vmmov 0   ;;  %v493_v31 = vmov 0.0   ;;  %v87_v53 = vlaneseq  ;;  %s758_s0 = inlined_call_operand.vmem [shape: f32[2,32,256], index: 0, kind: input, shape index: {}]   ;;  %s759_s1 = inlined_call_operand.vmem [shape: f32[32,128], index: 1, kind: input, shape index: {}]   ;;  %s760_s3 = inlined_call_operand.vmem [shape: f32[128,32], index: 3, kind: input, shape index: {}]   ;;  %s761_s2 = inlined_call_operand.vmem [shape: f32[1,128], index: 2, kind: input, shape index: {}]   ;;  %s762_s4 = inlined_call_operand.vmem [shape: f32[1,32], index: 4, kind: input, shape index: {}]   ;;  %s763_s5 = inlined_call_operand.vmem [shape: f32[2,32,256], index: 5, kind: output, shape index: {}]  }
   0x1   :  { %v527_v0 = vld [vmem:[%s758_s0 + $0x40] sm:$0xff]  ;;  %v532_v1 = vld [vmem:[%s758_s0 + $0x48] sm:$0xff]  ;;  %v549_v5 = vld [vmem:[%s758_s0 + $0x50] sm:$0xff]  ;;  %454 = vmatprep.subr.bf16.mxu0 %v491_v27  ;;  %460 = vmatprep.subr.bf16.mxu1 %v491_v27  ;;  %vm98_vm1 = vcmask 130112   ;;  %vm105_vm2 = vcmask 195712   ;;  %vm112_vm3 = vcmask 261312  }
   0x2   :  { %v537_v2 = vld [vmem:[%s758_s0] sm:$0xff]  ;;  %v48_v3 = vadd.f32 %v532_v1, %v527_v0  ;;  %v544_v4 = vld [vmem:[%s758_s0 + $0x8] sm:$0xff]  ;;  %v554_v6 = vld [vmem:[%s758_s0 + $0x58] sm:$0xff]  ;;  %416 = vmatprep.mubr.msk.f32.mxu0 %vm492_vm0, %v493_v31  ;;  %451 = vmatprep.mubr.msk.f32.mxu1 %vm492_vm0, %v493_v31  ;;  %v88_v55 = vand.u32 127, %v87_v53  ;;  %v674_v60 = vshrl.u32 %v87_v53, 7  ;;  %vm133_vm4 = vcmask 1041409  }
   0x3   :  { %v36_v7 = vadd.f32 %v544_v4, %v537_v2  ;;  %v561_v8 = vld [vmem:[%s758_s0 + $0x10] sm:$0xff]  ;;  %v566_v9 = vld [vmem:[%s758_s0 + $0x18] sm:$0xff]  ;;  %v51_v10 = vadd.f32 %v554_v6, %v549_v5  ;;  %v575_v12 = vld [vmem:[%s758_s0 + $0x60] sm:$0xff]  ;;  %vm135_vm5 = vcmask 261120  }
   0x4   :  { %49 = vadd.xlane.f32.xlu1 %v48_v3  ;;  %v39_v11 = vadd.f32 %v566_v9, %v561_v8  ;;  %v580_v13 = vld [vmem:[%s758_s0 + $0x68] sm:$0xff]  ;;  %v585_v14 = vld [vmem:[%s758_s0 + $0x20] sm:$0xff]  ;;  %v599_v18 = vld [vmem:[%s758_s0 + $0x70] sm:$0xff]  ;;  %v93_v57 = vadd.s32 4294967288, %v88_v55  ;;  %v100_v59 = vadd.s32 4294967280, %v88_v55  ;;  %v107_v3 = vadd.s32 4294967272, %v88_v55 }
   0x5   :  { %37 = vadd.xlane.f32.xlu0 %v36_v7  ;;  %v590_v15 = vld [vmem:[%s758_s0 + $0x28] sm:$0xff]  ;;  %v54_v16 = vadd.f32 %v580_v13, %v575_v12  ;;  %v604_v19 = vld [vmem:[%s758_s0 + $0x78] sm:$0xff]  ;;  %v609_v20 = vld [vmem:[%s758_s0 + $0x30] sm:$0xff] }
   0x6   :  { %v42_v17 = vadd.f32 %v590_v15, %v585_v14  ;;  %v614_v21 = vld [vmem:[%s758_s0 + $0x38] sm:$0xff]  ;;  %v57_v22 = vadd.f32 %v604_v19, %v599_v18  ;;  %v68_v24 = vld [vmem:[%s759_s1] sm:$0xff]  ;;  %v69_v25 = vld [vmem:[%s759_s1 + $0x8] sm:$0xff]  ;;  %v96_v62 = vsub.s32 %v93_v57, %v674_v60 }
   0x7   :  { %v45_v23 = vadd.f32 %v614_v21, %v609_v20  ;;  %v455_v26 = vpack.c.bf16 %v69_v25, %v68_v24  ;;  %v70_v28 = vld [vmem:[%s759_s1 + $0x10] sm:$0xff]  ;;  %v71_v29 = vld [vmem:[%s759_s1 + $0x18] sm:$0xff]  ;;  %v209_v32 = vld [vmem:[%s760_s3] sm:$0xff] }
   0x8   :  { %52 = vadd.xlane.f32.xlu1 %v51_v10  ;;  %v458_v30 = vpack.c.bf16 %v71_v29, %v70_v28  ;;  %v210_v33 = vld [vmem:[%s760_s3 + $0x8] sm:$0xff]  ;;  %v211_v34 = vld [vmem:[%s760_s3 + $0x10] sm:$0xff]  ;;  %v212_v36 = vld [vmem:[%s760_s3 + $0x18] sm:$0xff]  ;;  %v103_v10 = vsub.s32 %v100_v59, %v674_v60 }
   0x9   :  { %40 = vadd.xlane.f32.xlu0 %v39_v11  ;;  %456 = vmatpush3.bf16.msra.mxu0 %v455_v26  ;;  %v461_v35 = vpack.c.bf16 %v210_v33, %v209_v32  ;;  %v464_v37 = vpack.c.bf16 %v212_v36, %v211_v34  ;;  %v213_v38 = vld [vmem:[%s760_s3 + $0x20] sm:$0xff]  ;;  %v214_v39 = vld [vmem:[%s760_s3 + $0x28] sm:$0xff]  ;;  %v215_v41 = vld [vmem:[%s760_s3 + $0x30] sm:$0xff] }
   0xa   :  { %457 = vmatprep.subr.bf16.mxu0 %v491_v27  ;;  %v467_v40 = vpack.c.bf16 %v214_v39, %v213_v38  ;;  %v216_v42 = vld [vmem:[%s760_s3 + $0x38] sm:$0xff]  ;;  %v217_v44 = vld [vmem:[%s760_s3 + $0x40] sm:$0xff]  ;;  %v218_v45 = vld [vmem:[%s760_s3 + $0x48] sm:$0xff] }
   0xb   :  { %462 = vmatpush3.bf16.msra.mxu1 %v461_v35  ;;  %v470_v43 = vpack.c.bf16 %v216_v42, %v215_v41  ;;  %v473_v46 = vpack.c.bf16 %v218_v45, %v217_v44  ;;  %v219_v47 = vld [vmem:[%s760_s3 + $0x50] sm:$0xff]  ;;  %v220_v48 = vld [vmem:[%s760_s3 + $0x58] sm:$0xff]  ;;  %v221_v50 = vld [vmem:[%s760_s3 + $0x60] sm:$0xff] }
   0xc   :  { %55 = vadd.xlane.f32.xlu1 %v54_v16  ;;  %463 = vmatprep.subr.bf16.mxu1 %v491_v27  ;;  %v476_v49 = vpack.c.bf16 %v220_v48, %v219_v47  ;;  %v222_v51 = vld [vmem:[%s760_s3 + $0x68] sm:$0xff]  ;;  %v91_v16 = vsub.s32 %v88_v55, %v674_v60  ;;  %v224_v47 = vld [vmem:[%s760_s3 + $0x78] sm:$0xff] }
   0xd   :  { %43 = vadd.xlane.f32.xlu0 %v42_v17  ;;  %459 = vmatpush3.bf16.msra.mxu0 %v458_v30  ;;  %v479_v52 = vpack.c.bf16 %v222_v51, %v221_v50 }
   0xf   :  { %465 = vmatpush3.bf16.msra.mxu1 %v464_v37 }
  0x10   :  { %58 = vadd.xlane.f32.xlu1 %v57_v22  ;;  %466 = vmatprep.subr.bf16.mxu1 %v491_v27 }
  0x11   :  { %46 = vadd.xlane.f32.xlu0 %v45_v23 }
  0x13   :  { %468 = vmatpush3.bf16.msra.mxu1 %v467_v40 }
  0x14   :  { %469 = vmatprep.subr.bf16.mxu1 %v491_v27 }
  0x17   :  { %471 = vmatpush3.bf16.msra.mxu1 %v470_v43 }
  0x18   :  { %472 = vmatprep.subr.bf16.mxu1 %v491_v27 }
  0x1b   :  { %474 = vmatpush3.bf16.msra.mxu1 %v473_v46  ;;  %v223_v46 = vld [vmem:[%s760_s3 + $0x70] sm:$0xff] }
  0x1c   :  { %475 = vmatprep.subr.bf16.mxu1 %v491_v27  ;;  %v482_v48 = vpack.c.bf16 %v224_v47, %v223_v46 }
  0x1f   :  { %477 = vmatpush3.bf16.msra.mxu1 %v476_v49  ;;  %v382_v49 = vld [vmem:[%s761_s2] ss:$0 sm:$0xff] }
  0x20   :  { %478 = vmatprep.subr.bf16.mxu1 %v491_v27 }
  0x23   :  { %480 = vmatpush3.bf16.msra.mxu1 %v479_v52 }
  0x24   :  { %481 = vmatprep.subr.bf16.mxu1 %v491_v27  ;;  %v110_v27 = vsub.s32 %v107_v3, %v674_v60 }
  0x27   :  { %483 = vmatpush3.bf16.msra.mxu1 %v482_v48 }
  0x91   :  { %v50_v54 = vpop.xlane.xlu1 %49 }
  0x92   :  { %v38_v56 = vpop.xlane.xlu0 %37  ;;  %v64_v17 = vmul.f32 0.00390625, %v50_v54  ;;  %v384_v54 = vld [vmem:[%s762_s4] ss:$0 sm:$0xff] }
  0x93   :  { %v60_v24 = vmul.f32 0.00390625, %v38_v56 }
  0x94   :  { %v117_v31 = vrot.slane %v64_v17, %v91_v16 }
  0x95   :  { %v53_v58 = vpop.xlane.xlu1 %52  ;;  %v92_v35 = vrot.slane %v60_v24, %v91_v16 }
  0x96   :  { %v41_v61 = vpop.xlane.xlu0 %40  ;;  %v65_v63 = vmul.f32 0.00390625, %v53_v58 }
  0x97   :  { %v61_v7 = vmul.f32 0.00390625, %v41_v61 }
  0x98   :  { %v121_v26 = vrot.slane %v65_v63, %v96_v62 }
  0x99   :  { %v56_v11 = vpop.xlane.xlu1 %55  ;;  %v97_v28 = vrot.slane %v61_v7, %v96_v62  ;;  %v310_v62 = vsub.s32 0, %v674_v60  ;;  %v329_v7 = vsub.s32 1, %v674_v60 }
  0x9a   :  { %v66_v22 = vmul.f32 0.00390625, %v56_v11  ;;  %v44_v23 = vpop.xlane.xlu0 %43  ;;  %v122_v37 = vsel %vm98_vm1, %v121_v26, %v117_v31 }
  0x9b   :  { %v62_v25 = vmul.f32 0.00390625, %v44_v23  ;;  %v99_v39 = vsel %vm98_vm1, %v97_v28, %v92_v35 }
  0x9c   :  { %v126_v29 = vrot.slane %v66_v22, %v103_v10 }
  0x9d   :  { %v59_v30 = vpop.xlane.xlu1 %58  ;;  %v104_v32 = vrot.slane %v62_v25, %v103_v10 }
  0x9e   :  { %v67_v33 = vmul.f32 0.00390625, %v59_v30  ;;  %v47_v34 = vpop.xlane.xlu0 %46  ;;  %v127_v40 = vsel %vm105_vm2, %v126_v29, %v122_v37 }
  0x9f   :  { %v63_v36 = vmul.f32 0.00390625, %v47_v34  ;;  %v106_v42 = vsel %vm105_vm2, %v104_v32, %v99_v39 }
  0xa0   :  { %v131_v38 = vrot.slane %v67_v33, %v110_v27 }
  0xa1   :  { %v111_v41 = vrot.slane %v63_v36, %v110_v27 }
  0xa2   :  { %v132_v43 = vsel %vm112_vm3, %v131_v38, %v127_v40 }
  0xa3   :  { %v113_v44 = vsel %vm112_vm3, %v111_v41, %v106_v42 }
  0xa4   :  { %v134_v45 = vsel %vm133_vm4, %v132_v43, %v113_v44 }
  0xa5   :  { %417 = vmatmul.mubr.msk.f32.vlgmr.msra.gmra.mrb[0].mxu0 %vm135_vm5, %v134_v45 }
 0x178   :  { %v204_v50 = vpop.f32.mrb[0].mxu0 }
 0x179   :  { %v205_v51 = vadd.f32 %v382_v49, %v204_v50  ;;  %v418_v52 = vpop.f32.mrb[1].mxu0 }
 0x17b   :  { %v208_v53 = vmax.f32 %v205_v51, 0.0 }
 0x17d   :  { %452 = vmatmul.mubr.f32.vlgmr.msra.gmra.mrb[0].mxu1 %v208_v53 }
 0x250   :  { %v298_v55 = vpop.f32.mrb[0].mxu1 }
 0x251   :  { %v299_v56 = vadd.f32 %v384_v54, %v298_v55  ;;  %v453_v57 = vpop.f32.mrb[1].mxu1 }
 0x253   :  { %v385_v58 = vmul.f32 -1.442695, %v299_v56 }
 0x255   :  { %487 = vpow2.f32 %v385_v58 }
 0x25f   :  { %v488_v59 = vpop.eup %487 }
 0x260   :  { %v305_v61 = vadd.f32 1.0, %v488_v59 }
 0x262   :  { %489 = vrcp.f32 %v305_v61 }
 0x26c   :  { %v490_v63 = vpop.eup %489 }
 0x26d   :  { %v311_v3 = vrot.slane %v490_v63, %v310_v62  ;;  %v330_v10 = vrot.slane %v490_v63, %v329_v7 }
 0x26f   :  { %317 = vbcast.lane.b32.xlu1 %v311_v3, 264  ;;  %313 = vbcast.lane.b32.xlu0 %v311_v3, 256 }
 0x273   :  { %321 = vbcast.lane.b32.xlu1 %v311_v3, 272  ;;  %332 = vbcast.lane.b32.xlu0 %v330_v10, 256 }
 0x277   :  { %325 = vbcast.lane.b32.xlu1 %v311_v3, 280  ;;  %340 = vbcast.lane.b32.xlu0 %v330_v10, 272 }
 0x27b   :  { %336 = vbcast.lane.b32.xlu1 %v330_v10, 264 }
 0x27f   :  { %344 = vbcast.lane.b32.xlu1 %v330_v10, 280 }
 0x2e1   :  { %v318_v11 = vpop.permute.xlu1 %317  ;;  %v314_v16 = vpop.permute.xlu0 %313 }
 0x2e2   :  { %v348_v17 = vmul.f32 %v318_v11, %v561_v8  ;;  %v349_v22 = vmul.f32 %v318_v11, %v566_v9  ;;  %v346_v23 = vmul.f32 %v314_v16, %v537_v2  ;;  %v347_v24 = vmul.f32 %v314_v16, %v544_v4 }
 0x2e4   :  { %364 = vst [vmem:[%s763_s5 + $0x10] sm:$0xff] %v348_v17  ;;  %365 = vst [vmem:[%s763_s5 + $0x18] sm:$0xff] %v349_v22 }
 0x2e5   :  { %362 = vst [vmem:[%s763_s5] sm:$0xff] %v346_v23  ;;  %363 = vst [vmem:[%s763_s5 + $0x8] sm:$0xff] %v347_v24  ;;  %v322_v8 = vpop.permute.xlu1 %321  ;;  %v333_v2 = vpop.permute.xlu0 %332 }
 0x2e6   :  { %v350_v4 = vmul.f32 %v322_v8, %v585_v14  ;;  %v351_v9 = vmul.f32 %v322_v8, %v590_v15  ;;  %v354_v60 = vmul.f32 %v333_v2, %v527_v0  ;;  %v355_v25 = vmul.f32 %v333_v2, %v532_v1 }
 0x2e8   :  { %366 = vst [vmem:[%s763_s5 + $0x20] sm:$0xff] %v350_v4  ;;  %367 = vst [vmem:[%s763_s5 + $0x28] sm:$0xff] %v351_v9 }
 0x2e9   :  { %370 = vst [vmem:[%s763_s5 + $0x40] sm:$0xff] %v354_v60  ;;  %371 = vst [vmem:[%s763_s5 + $0x48] sm:$0xff] %v355_v25  ;;  %v326_v14 = vpop.permute.xlu1 %325  ;;  %v341_v0 = vpop.permute.xlu0 %340 }
 0x2ea   :  { %v352_v1 = vmul.f32 %v326_v14, %v609_v20  ;;  %v353_v15 = vmul.f32 %v326_v14, %v614_v21  ;;  %v358_v26 = vmul.f32 %v341_v0, %v575_v12  ;;  %v359_v27 = vmul.f32 %v341_v0, %v580_v13 }
 0x2ec   :  { %368 = vst [vmem:[%s763_s5 + $0x30] sm:$0xff] %v352_v1  ;;  %369 = vst [vmem:[%s763_s5 + $0x38] sm:$0xff] %v353_v15 }
 0x2ed   :  { %374 = vst [vmem:[%s763_s5 + $0x60] sm:$0xff] %v358_v26  ;;  %375 = vst [vmem:[%s763_s5 + $0x68] sm:$0xff] %v359_v27  ;;  %v337_v20 = vpop.permute.xlu1 %336 }
 0x2ee   :  { %v356_v12 = vmul.f32 %v337_v20, %v549_v5  ;;  %v357_v13 = vmul.f32 %v337_v20, %v554_v6 }
 0x2f0   :  { %372 = vst [vmem:[%s763_s5 + $0x50] sm:$0xff] %v356_v12  ;;  %373 = vst [vmem:[%s763_s5 + $0x58] sm:$0xff] %v357_v13 }
 0x2f1   :  { %v345_v21 = vpop.permute.xlu1 %344 }
 0x2f2   :  { %v360_v28 = vmul.f32 %v345_v21, %v599_v18  ;;  %v361_v29 = vmul.f32 %v345_v21, %v604_v19 }
 0x2f4   :  { %376 = vst [vmem:[%s763_s5 + $0x70] sm:$0xff] %v360_v28  ;;  %377 = vst [vmem:[%s763_s5 + $0x78] sm:$0xff] %v361_v29 }

</bundles_post_ra>
